<compile_context>
chip_gen: v6e
topology: v6e:2x2x1
jax: 0.10.0
libtpu: 0.0.40
codegen_flags: <defaults>
</compile_context>

<pallas_src>
import jax
import jax.numpy as jnp
import numpy as np
from jax.experimental import pallas as pl
from jax.experimental.pallas import tpu as pltpu

LEAK = 0.2      # LeakyReLU negative slope
EPS = 1e-5      # BatchNorm1d eps
K = 5           # conv kernel size
P = 2           # conv padding


def _round_up(v, m):
    return -(-v // m) * m


def _leaky(x):
    return jnp.where(x > 0, x, LEAK * x)


def _make_kernel(N, L, Wlane, has_projection):
    Lp = L + 2 * P
    inv_count = 1.0 / float(N * L)

    def conv_taps(w_ref, src):
        # One 128-aligned MXU matmul per tap; shift via pltpu.roll of the source
        # (XLU) instead of unaligned lane slices.  Wrapped columns (<= P per end)
        # read per-sample zero padding / round-up zeros, so the result is exact.
        acc = jnp.dot(w_ref[P], src, preferred_element_type=jnp.float32)
        for k in range(K):
            if k == P:
                continue
            src_k = pltpu.roll(src, (P - k) % Wlane, axis=1)
            acc = acc + jnp.dot(w_ref[k], src_k, preferred_element_type=jnp.float32)
        return acc

    def body(x_ref, w1_ref, w2_ref, pr_ref, ws_ref, out_ref):
        x = x_ref[...]                                        # (Cin8, Wlane)

        # ---- validity mask over the folded lane axis, generated in-kernel ----
        lanes_i = jax.lax.broadcasted_iota(jnp.int32, (1, Wlane), 1)
        lanes_f = lanes_i.astype(jnp.float32)
        q = jnp.floor(lanes_f / float(Lp))
        within = lanes_f - q * float(Lp)
        mask = jnp.where((lanes_i < N * Lp)
                         & (within >= float(P))
                         & (within < float(P + L)), 1.0, 0.0)  # (1, Wlane) f32

        # ---- channel reductions on the (idle) MXU -----------------------------
        ones_col = jnp.ones((Wlane, 1), jnp.float32)

        def bn_scale_shift(h, gamma, beta, premasked):
            # Masked biased batch statistics folded into per-channel scale/shift.
            hm = h if premasked else h * mask
            s1 = jnp.dot(hm, ones_col, preferred_element_type=jnp.float32)      # (C,1)
            s2 = jnp.dot(hm * h, ones_col, preferred_element_type=jnp.float32)  # (C,1)
            mean = s1 * inv_count
            var = s2 * inv_count - mean * mean
            scale = gamma * jax.lax.rsqrt(var + EPS)
            shift = beta - mean * scale
            return scale, shift

        g1, be1 = pr_ref[:, 0:1], pr_ref[:, 1:2]
        g2, be2 = pr_ref[:, 2:3], pr_ref[:, 3:4]

        # ---- conv1 + bn1 + LeakyReLU (conv bias dropped: cancels in BN) ------
        h1 = conv_taps(w1_ref, x)
        sc1, sh1 = bn_scale_shift(h1, g1, be1, premasked=False)
        y1m = _leaky(h1 * sc1 + sh1) * mask    # masked => conv2 sees zero padding

        # ---- conv2 + bn2 ------------------------------------------------------
        h2 = conv_taps(w2_ref, y1m)
        sc2, sh2 = bn_scale_shift(h2, g2, be2, premasked=False)
        y2 = h2 * sc2 + sh2

        # ---- shortcut ---------------------------------------------------------
        if has_projection:
            gs, bes = pr_ref[:, 4:5], pr_ref[:, 5:6]
            rs = jnp.dot(ws_ref[...], x, preferred_element_type=jnp.float32)
            # rs is already zero at padding columns (x is zero there, no bias),
            # so its BN statistics need no extra mask pass.
            scs, shs = bn_scale_shift(rs, gs, bes, premasked=True)
            rs = rs * scs + shs
        else:
            rs = x

        # mask=0 columns carry don't-care values; the wrapper crops them.
        out_ref[...] = _leaky(y2 + rs)

    if has_projection:
        def kernel(x_ref, w1_ref, w2_ref, pr_ref, ws_ref, out_ref):
            body(x_ref, w1_ref, w2_ref, pr_ref, ws_ref, out_ref)
    else:
        def kernel(x_ref, w1_ref, w2_ref, pr_ref, out_ref):
            body(x_ref, w1_ref, w2_ref, pr_ref, None, out_ref)

    return kernel


def _padded_vmem_bytes(shape, itemsize=4):
    shape = tuple(int(s) for s in shape)
    if len(shape) == 1:
        shape = (1,) + shape
    lead = int(np.prod(shape[:-2])) if len(shape) > 2 else 1
    return lead * _round_up(shape[-2], 8) * _round_up(shape[-1], 128) * itemsize


def _vmem_limit_bytes(footprint):
    # Generation-aware cap: ~75% of physical VMEM (v7x: 64 MiB/TC, v5e/v6e: 128 MiB)
    # instead of a one-size-fits-all 64 MiB.
    try:
        cap = int(0.75 * pltpu.get_tpu_info().vmem_capacity_bytes)
    except Exception:  # conservative fallback, safe on every generation
        cap = 48 << 20
    want = int(1.5 * footprint) + (2 << 20)
    return int(min(max(want, 8 << 20), max(cap, 8 << 20)))


def residual_block(x, params, stride=1):
    """x: (N, Cin, L) float32, NCL layout like PyTorch Conv1d (training-mode BN)."""
    # TODO(synk): stride > 1 (downsampling) path not implemented in the kernel.
    assert stride == 1, "only stride=1 supported"
    N, Cin, L = x.shape
    Cout = params["w1"].shape[0]
    has_projection = (Cin != Cout) or (stride != 1)

    Lp = L + 2 * P
    Cin8 = _round_up(Cin, 8)
    Cout8 = _round_up(Cout, 8)
    Wlane = _round_up(N * Lp, 128)

    # ---- fold input: (N, Cin, L) -> channel-major (Cin8, Wlane) -----------------
    # Per-sample zero padding of P columns, lane axis rounded up to 128.
    # (Single jnp.pad's; for a stack of blocks this fold/unfold should be hoisted.)
    xp = jnp.pad(x.astype(jnp.float32), ((0, 0), (0, 0), (P, P)))   # (N, Cin, Lp)
    xf = jnp.transpose(xp, (1, 0, 2)).reshape(Cin, N * Lp)
    xpad_w = jnp.pad(xf, ((0, Cin8 - Cin), (0, Wlane - N * Lp)))

    def pad_taps(w, co, ci):   # (co_raw, ci_raw, K) -> (K, co, ci), zero-padded
        wk = jnp.transpose(w.astype(jnp.float32), (2, 0, 1))
        return jnp.pad(wk, ((0, 0), (0, co - w.shape[0]), (0, ci - w.shape[1])))

    def col(v, c):             # (c_raw,) -> (c, 1), zero-padded
        return jnp.pad(v.astype(jnp.float32), (0, c - v.shape[0]))[:, None]

    w1k = pad_taps(params["w1"], Cout8, Cin8)
    w2k = pad_taps(params["w2"], Cout8, Cout8)

    # Pack all per-channel BN parameters into ONE small array (one DMA).
    # Conv biases are intentionally not passed: they cancel in training-mode BN.
    cols = [params["g1"], params["be1"], params["g2"], params["be2"]]
    if has_projection:
        cols += [params["gs"], params["bes"]]
    pr = jnp.concatenate([col(v, Cout8) for v in cols], axis=1)

    inputs = [xpad_w, w1k, w2k, pr]
    if has_projection:
        ws2 = jnp.pad(params["ws"][:, :, 0].astype(jnp.float32),
                      ((0, Cout8 - Cout), (0, Cin8 - Cin)))
        inputs.append(ws2)

    kernel = _make_kernel(N, L, Wlane, has_projection)
    vspec = lambda: pl.BlockSpec(memory_space=pltpu.MemorySpace.VMEM)

    # VMEM budget: inputs + output + ~8 full-width f32 compiler temporaries
    # (h1/h2/rs, masked products, rolled tap sources, fused activations) +
    # the ones column + iota/mask rows, with 1.5x headroom and a chip-derived cap.
    footprint = sum(_padded_vmem_bytes(a.shape) for a in inputs)
    footprint += _padded_vmem_bytes((Cout8, Wlane))          # output
    footprint += 8 * _padded_vmem_bytes((Cout8, Wlane))      # compiler temporaries
    footprint += _padded_vmem_bytes((Wlane, 1))              # ones column (MXU reduce)
    footprint += _padded_vmem_bytes((8, Wlane))              # iota / mask
    vmem_limit = _vmem_limit_bytes(footprint)

    # TODO(synk): for large N*L, tile the folded lane axis with a grid and a
    # two-phase BatchNorm reduction, marking the lane-tile axis "parallel"
    # (v7x dual TensorCore); currently a single whole-slab-resident invocation.
    out2d = pl.pallas_call(
        kernel,
        out_shape=jax.ShapeDtypeStruct((Cout8, Wlane), jnp.float32),
        in_specs=[vspec() for _ in inputs],
        out_specs=vspec(),
        compiler_params=pltpu.CompilerParams(vmem_limit_bytes=vmem_limit),
    )(*inputs)

    # (Cout8, Wlane) -> drop channel/lane padding -> (N, Cout, L)
    out = out2d[:Cout, :N * Lp].reshape(Cout, N, Lp)[:, :, P:P + L]
    return jnp.transpose(out, (1, 0, 2))


# ---------------- pure-JAX reference (same math, NCL layout) ----------------
def ref_residual_block(x, p, stride=1):
    assert stride == 1

    def conv1d(xx, w, b, pad):
        n, _, length = xx.shape
        co, _, kk = w.shape
        xpd = jnp.pad(xx, ((0, 0), (0, 0), (pad, pad)))
        out = jnp.zeros((n, co, length), jnp.float32)
        for k in range(kk):
            out = out + jnp.einsum('oi,nil->nol', w[:, :, k], xpd[:, :, k:k + length])
        return out + b[None, :, None]

    def bn(y, g, b):
        m = y.mean(axis=(0, 2), keepdims=True)
        v = ((y - m) ** 2).mean(axis=(0, 2), keepdims=True)
        return (y - m) / jnp.sqrt(v + EPS) * g[None, :, None] + b[None, :, None]

    lrelu = lambda z: jnp.where(z > 0, z, LEAK * z)
    cin, cout = x.shape[1], p["w1"].shape[0]
    if cin != cout or stride != 1:
        res = bn(conv1d(x, p["ws"], p["bs"], 0), p["gs"], p["bes"])
    else:
        res = x
    h = lrelu(bn(conv1d(x, p["w1"], p["b1"], P), p["g1"], p["be1"]))
    h = bn(conv1d(h, p["w2"], p["b2"], P), p["g2"], p["be2"])
    return lrelu(h + res)


def _make_params(key, cin, cout):
    ks = jax.random.split(key, 12)
    return dict(
        w1=0.1 * jax.random.normal(ks[0], (cout, cin, K), jnp.float32),
        b1=0.1 * jax.random.normal(ks[1], (cout,), jnp.float32),
        g1=1.0 + 0.1 * jax.random.normal(ks[2], (cout,), jnp.float32),
        be1=0.1 * jax.random.normal(ks[3], (cout,), jnp.float32),
        w2=0.1 * jax.random.normal(ks[4], (cout, cout, K), jnp.float32),
        b2=0.1 * jax.random.normal(ks[5], (cout,), jnp.float32),
        g2=1.0 + 0.1 * jax.random.normal(ks[6], (cout,), jnp.float32),
        be2=0.1 * jax.random.normal(ks[7], (cout,), jnp.float32),
        ws=0.1 * jax.random.normal(ks[8], (cout, cin, 1), jnp.float32),
        bs=0.1 * jax.random.normal(ks[9], (cout,), jnp.float32),
        gs=1.0 + 0.1 * jax.random.normal(ks[10], (cout,), jnp.float32),
        bes=0.1 * jax.random.normal(ks[11], (cout,), jnp.float32),
    )


if __name__ == "__main__":
    key = jax.random.PRNGKey(0)
    k_pp, k_px, k_ip, k_ix = jax.random.split(key, 4)

    # 1) projection-shortcut path: in_channels != out_channels
    N, Cin, Cout, L = 2, 4, 8, 16
    params_p = _make_params(k_pp, Cin, Cout)
    x_p = jax.random.normal(k_px, (N, Cin, L), jnp.float32)
    out_p = jax.block_until_ready(residual_block(x_p, params_p, stride=1))
    ref_p = jax.block_until_ready(ref_residual_block(x_p, params_p, stride=1))
    np.testing.assert_allclose(np.asarray(out_p), np.asarray(ref_p), rtol=1e-3, atol=1e-3)

    # 2) identity-shortcut path: in_channels == out_channels
    params_i = _make_params(k_ip, Cout, Cout)
    x_i = jax.random.normal(k_ix, (N, Cout, L), jnp.float32)
    out_i = jax.block_until_ready(residual_block(x_i, params_i, stride=1))
    ref_i = jax.block_until_ready(ref_residual_block(x_i, params_i, stride=1))
    np.testing.assert_allclose(np.asarray(out_i), np.asarray(ref_i), rtol=1e-3, atol=1e-3)

    print("KERNEL_OK")
</pallas_src>

<mosaic_0001>
module attributes {stable_mosaic.version = 11 : i64} {
  func.func @kernel(%arg0: memref<8x128xf32, #tpu.memory_space<vmem>>, %arg1: memref<5x8x8xf32, #tpu.memory_space<vmem>>, %arg2: memref<5x8x8xf32, #tpu.memory_space<vmem>>, %arg3: memref<8x6xf32, #tpu.memory_space<vmem>>, %arg4: memref<8x8xf32, #tpu.memory_space<vmem>>, %arg5: memref<8x128xf32, #tpu.memory_space<vmem>>) attributes {dimension_semantics = [], scalar_prefetch = 0 : i64, scratch_operands = 0 : i64, tpu.core_type = #tpu.core_type<tc>} {
    %c0 = arith.constant 0 : index
    %c0_0 = arith.constant 0 : index
    %0 = vector.load %arg0[%c0, %c0_0] : memref<8x128xf32, #tpu.memory_space<vmem>>, vector<8x128xf32>
    %1 = tpu.iota {dimensions = array<i32: 1>} : vector<1x128xi32>
    %2 = arith.sitofp %1 : vector<1x128xi32> to vector<1x128xf32>
    %cst = arith.constant 2.000000e+01 : f32
    %3 = vector.broadcast %cst : f32 to vector<1x128xf32>
    %4 = arith.divf %2, %3 : vector<1x128xf32>
    %5 = math.floor %4 : vector<1x128xf32>
    %cst_1 = arith.constant 2.000000e+01 : f32
    %6 = vector.broadcast %cst_1 : f32 to vector<1x128xf32>
    %7 = arith.mulf %5, %6 : vector<1x128xf32>
    %8 = arith.subf %2, %7 : vector<1x128xf32>
    %c40_i32 = arith.constant 40 : i32
    %9 = vector.broadcast %c40_i32 : i32 to vector<1x128xi32>
    %10 = arith.cmpi slt, %1, %9 : vector<1x128xi32>
    %cst_2 = arith.constant 2.000000e+00 : f32
    %11 = vector.broadcast %cst_2 : f32 to vector<1x128xf32>
    %12 = arith.cmpf oge, %8, %11 : vector<1x128xf32>
    %13 = arith.andi %10, %12 : vector<1x128xi1>
    %cst_3 = arith.constant 1.800000e+01 : f32
    %14 = vector.broadcast %cst_3 : f32 to vector<1x128xf32>
    %15 = arith.cmpf olt, %8, %14 : vector<1x128xf32>
    %16 = arith.andi %13, %15 : vector<1x128xi1>
    %cst_4 = arith.constant 1.000000e+00 : f32
    %cst_5 = arith.constant 0.000000e+00 : f32
    %17 = vector.broadcast %cst_4 : f32 to vector<1x128xf32>
    %18 = vector.broadcast %cst_5 : f32 to vector<1x128xf32>
    %19 = arith.select %16, %17, %18 : vector<1x128xi1>, vector<1x128xf32>
    %cst_6 = arith.constant 1.000000e+00 : f32
    %20 = vector.broadcast %cst_6 : f32 to vector<128x1xf32>
    %c0_7 = arith.constant 0 : index
    %c0_8 = arith.constant 0 : index
    %21 = vector.load %arg3[%c0_7, %c0_8] : memref<8x6xf32, #tpu.memory_space<vmem>>, vector<8x1xf32>
    %c0_9 = arith.constant 0 : index
    %c1 = arith.constant 1 : index
    %22 = vector.load %arg3[%c0_9, %c1] : memref<8x6xf32, #tpu.memory_space<vmem>>, vector<8x1xf32>
    %c0_10 = arith.constant 0 : index
    %c2 = arith.constant 2 : index
    %23 = vector.load %arg3[%c0_10, %c2] : memref<8x6xf32, #tpu.memory_space<vmem>>, vector<8x1xf32>
    %c0_11 = arith.constant 0 : index
    %c3 = arith.constant 3 : index
    %24 = vector.load %arg3[%c0_11, %c3] : memref<8x6xf32, #tpu.memory_space<vmem>>, vector<8x1xf32>
    %c2_12 = arith.constant 2 : index
    %c0_13 = arith.constant 0 : index
    %c0_14 = arith.constant 0 : index
    %25 = vector.load %arg1[%c2_12, %c0_13, %c0_14] : memref<5x8x8xf32, #tpu.memory_space<vmem>>, vector<1x8x8xf32>
    %26 = vector.shape_cast %25 : vector<1x8x8xf32> to vector<8x8xf32>
    %cst_15 = arith.constant dense<0.000000e+00> : vector<8x128xf32>
    %27 = tpu.matmul %26, %0, %cst_15 {dimension_numbers = #tpu.dot_dimension_numbers<[1], [0], [0], [1], [0, 0, 1, 1], [], []>} : vector<8x8xf32>, vector<8x128xf32>, vector<8x128xf32> -> vector<8x128xf32>
    %c2_i32 = arith.constant 2 : i32
    %28 = tpu.dynamic_rotate %0 by %c2_i32 dim 1 : vector<8x128xf32>, i32 -> vector<8x128xf32>
    %c0_16 = arith.constant 0 : index
    %c0_17 = arith.constant 0 : index
    %c0_18 = arith.constant 0 : index
    %29 = vector.load %arg1[%c0_16, %c0_17, %c0_18] : memref<5x8x8xf32, #tpu.memory_space<vmem>>, vector<1x8x8xf32>
    %30 = vector.shape_cast %29 : vector<1x8x8xf32> to vector<8x8xf32>
    %cst_19 = arith.constant dense<0.000000e+00> : vector<8x128xf32>
    %31 = tpu.matmul %30, %28, %cst_19 {dimension_numbers = #tpu.dot_dimension_numbers<[1], [0], [0], [1], [0, 0, 1, 1], [], []>} : vector<8x8xf32>, vector<8x128xf32>, vector<8x128xf32> -> vector<8x128xf32>
    %32 = arith.addf %27, %31 : vector<8x128xf32>
    %c1_i32 = arith.constant 1 : i32
    %33 = tpu.dynamic_rotate %0 by %c1_i32 dim 1 : vector<8x128xf32>, i32 -> vector<8x128xf32>
    %c1_20 = arith.constant 1 : index
    %c0_21 = arith.constant 0 : index
    %c0_22 = arith.constant 0 : index
    %34 = vector.load %arg1[%c1_20, %c0_21, %c0_22] : memref<5x8x8xf32, #tpu.memory_space<vmem>>, vector<1x8x8xf32>
    %35 = vector.shape_cast %34 : vector<1x8x8xf32> to vector<8x8xf32>
    %cst_23 = arith.constant dense<0.000000e+00> : vector<8x128xf32>
    %36 = tpu.matmul %35, %33, %cst_23 {dimension_numbers = #tpu.dot_dimension_numbers<[1], [0], [0], [1], [0, 0, 1, 1], [], []>} : vector<8x8xf32>, vector<8x128xf32>, vector<8x128xf32> -> vector<8x128xf32>
    %37 = arith.addf %32, %36 : vector<8x128xf32>
    %c127_i32 = arith.constant 127 : i32
    %38 = tpu.dynamic_rotate %0 by %c127_i32 dim 1 : vector<8x128xf32>, i32 -> vector<8x128xf32>
    %c3_24 = arith.constant 3 : index
    %c0_25 = arith.constant 0 : index
    %c0_26 = arith.constant 0 : index
    %39 = vector.load %arg1[%c3_24, %c0_25, %c0_26] : memref<5x8x8xf32, #tpu.memory_space<vmem>>, vector<1x8x8xf32>
    %40 = vector.shape_cast %39 : vector<1x8x8xf32> to vector<8x8xf32>
    %cst_27 = arith.constant dense<0.000000e+00> : vector<8x128xf32>
    %41 = tpu.matmul %40, %38, %cst_27 {dimension_numbers = #tpu.dot_dimension_numbers<[1], [0], [0], [1], [0, 0, 1, 1], [], []>} : vector<8x8xf32>, vector<8x128xf32>, vector<8x128xf32> -> vector<8x128xf32>
    %42 = arith.addf %37, %41 : vector<8x128xf32>
    %c126_i32 = arith.constant 126 : i32
    %43 = tpu.dynamic_rotate %0 by %c126_i32 dim 1 : vector<8x128xf32>, i32 -> vector<8x128xf32>
    %c4 = arith.constant 4 : index
    %c0_28 = arith.constant 0 : index
    %c0_29 = arith.constant 0 : index
    %44 = vector.load %arg1[%c4, %c0_28, %c0_29] : memref<5x8x8xf32, #tpu.memory_space<vmem>>, vector<1x8x8xf32>
    %45 = vector.shape_cast %44 : vector<1x8x8xf32> to vector<8x8xf32>
    %cst_30 = arith.constant dense<0.000000e+00> : vector<8x128xf32>
    %46 = tpu.matmul %45, %43, %cst_30 {dimension_numbers = #tpu.dot_dimension_numbers<[1], [0], [0], [1], [0, 0, 1, 1], [], []>} : vector<8x8xf32>, vector<8x128xf32>, vector<8x128xf32> -> vector<8x128xf32>
    %47 = arith.addf %42, %46 : vector<8x128xf32>
    %48 = vector.broadcast %19 : vector<1x128xf32> to vector<8x128xf32>
    %49 = arith.mulf %47, %48 : vector<8x128xf32>
    %cst_31 = arith.constant dense<0.000000e+00> : vector<8x1xf32>
    %50 = tpu.matmul %49, %20, %cst_31 {dimension_numbers = #tpu.dot_dimension_numbers<[1], [0], [0], [1], [0, 0, 1, 1], [], []>} : vector<8x128xf32>, vector<128x1xf32>, vector<8x1xf32> -> vector<8x1xf32>
    %51 = arith.mulf %49, %47 : vector<8x128xf32>
    %cst_32 = arith.constant dense<0.000000e+00> : vector<8x1xf32>
    %52 = tpu.matmul %51, %20, %cst_32 {dimension_numbers = #tpu.dot_dimension_numbers<[1], [0], [0], [1], [0, 0, 1, 1], [], []>} : vector<8x128xf32>, vector<128x1xf32>, vector<8x1xf32> -> vector<8x1xf32>
    %cst_33 = arith.constant 3.125000e-02 : f32
    %53 = vector.broadcast %cst_33 : f32 to vector<8x1xf32>
    %54 = arith.mulf %50, %53 : vector<8x1xf32>
    %cst_34 = arith.constant 3.125000e-02 : f32
    %55 = vector.broadcast %cst_34 : f32 to vector<8x1xf32>
    %56 = arith.mulf %52, %55 : vector<8x1xf32>
    %57 = arith.mulf %54, %54 : vector<8x1xf32>
    %58 = arith.subf %56, %57 : vector<8x1xf32>
    %cst_35 = arith.constant 9.99999974E-6 : f32
    %59 = vector.broadcast %cst_35 : f32 to vector<8x1xf32>
    %60 = arith.addf %58, %59 : vector<8x1xf32>
    %61 = math.rsqrt %60 : vector<8x1xf32>
    %62 = arith.mulf %21, %61 : vector<8x1xf32>
    %63 = arith.mulf %54, %62 : vector<8x1xf32>
    %64 = arith.subf %22, %63 : vector<8x1xf32>
    %65 = vector.broadcast %62 : vector<8x1xf32> to vector<8x128xf32>
    %66 = arith.mulf %47, %65 : vector<8x128xf32>
    %67 = vector.broadcast %64 : vector<8x1xf32> to vector<8x128xf32>
    %68 = arith.addf %66, %67 : vector<8x128xf32>
    %cst_36 = arith.constant 0.000000e+00 : f32
    %69 = vector.broadcast %cst_36 : f32 to vector<8x128xf32>
    %70 = arith.cmpf ogt, %68, %69 : vector<8x128xf32>
    %cst_37 = arith.constant 2.000000e-01 : f32
    %71 = vector.broadcast %cst_37 : f32 to vector<8x128xf32>
    %72 = arith.mulf %71, %68 : vector<8x128xf32>
    %73 = arith.select %70, %68, %72 : vector<8x128xi1>, vector<8x128xf32>
    %74 = vector.broadcast %19 : vector<1x128xf32> to vector<8x128xf32>
    %75 = arith.mulf %73, %74 : vector<8x128xf32>
    %c2_38 = arith.constant 2 : index
    %c0_39 = arith.constant 0 : index
    %c0_40 = arith.constant 0 : index
    %76 = vector.load %arg2[%c2_38, %c0_39, %c0_40] : memref<5x8x8xf32, #tpu.memory_space<vmem>>, vector<1x8x8xf32>
    %77 = vector.shape_cast %76 : vector<1x8x8xf32> to vector<8x8xf32>
    %cst_41 = arith.constant dense<0.000000e+00> : vector<8x128xf32>
    %78 = tpu.matmul %77, %75, %cst_41 {dimension_numbers = #tpu.dot_dimension_numbers<[1], [0], [0], [1], [0, 0, 1, 1], [], []>} : vector<8x8xf32>, vector<8x128xf32>, vector<8x128xf32> -> vector<8x128xf32>
    %c2_i32_42 = arith.constant 2 : i32
    %79 = tpu.dynamic_rotate %75 by %c2_i32_42 dim 1 : vector<8x128xf32>, i32 -> vector<8x128xf32>
    %c0_43 = arith.constant 0 : index
    %c0_44 = arith.constant 0 : index
    %c0_45 = arith.constant 0 : index
    %80 = vector.load %arg2[%c0_43, %c0_44, %c0_45] : memref<5x8x8xf32, #tpu.memory_space<vmem>>, vector<1x8x8xf32>
    %81 = vector.shape_cast %80 : vector<1x8x8xf32> to vector<8x8xf32>
    %cst_46 = arith.constant dense<0.000000e+00> : vector<8x128xf32>
    %82 = tpu.matmul %81, %79, %cst_46 {dimension_numbers = #tpu.dot_dimension_numbers<[1], [0], [0], [1], [0, 0, 1, 1], [], []>} : vector<8x8xf32>, vector<8x128xf32>, vector<8x128xf32> -> vector<8x128xf32>
    %83 = arith.addf %78, %82 : vector<8x128xf32>
    %c1_i32_47 = arith.constant 1 : i32
    %84 = tpu.dynamic_rotate %75 by %c1_i32_47 dim 1 : vector<8x128xf32>, i32 -> vector<8x128xf32>
    %c1_48 = arith.constant 1 : index
    %c0_49 = arith.constant 0 : index
    %c0_50 = arith.constant 0 : index
    %85 = vector.load %arg2[%c1_48, %c0_49, %c0_50] : memref<5x8x8xf32, #tpu.memory_space<vmem>>, vector<1x8x8xf32>
    %86 = vector.shape_cast %85 : vector<1x8x8xf32> to vector<8x8xf32>
    %cst_51 = arith.constant dense<0.000000e+00> : vector<8x128xf32>
    %87 = tpu.matmul %86, %84, %cst_51 {dimension_numbers = #tpu.dot_dimension_numbers<[1], [0], [0], [1], [0, 0, 1, 1], [], []>} : vector<8x8xf32>, vector<8x128xf32>, vector<8x128xf32> -> vector<8x128xf32>
    %88 = arith.addf %83, %87 : vector<8x128xf32>
    %c127_i32_52 = arith.constant 127 : i32
    %89 = tpu.dynamic_rotate %75 by %c127_i32_52 dim 1 : vector<8x128xf32>, i32 -> vector<8x128xf32>
    %c3_53 = arith.constant 3 : index
    %c0_54 = arith.constant 0 : index
    %c0_55 = arith.constant 0 : index
    %90 = vector.load %arg2[%c3_53, %c0_54, %c0_55] : memref<5x8x8xf32, #tpu.memory_space<vmem>>, vector<1x8x8xf32>
    %91 = vector.shape_cast %90 : vector<1x8x8xf32> to vector<8x8xf32>
    %cst_56 = arith.constant dense<0.000000e+00> : vector<8x128xf32>
    %92 = tpu.matmul %91, %89, %cst_56 {dimension_numbers = #tpu.dot_dimension_numbers<[1], [0], [0], [1], [0, 0, 1, 1], [], []>} : vector<8x8xf32>, vector<8x128xf32>, vector<8x128xf32> -> vector<8x128xf32>
    %93 = arith.addf %88, %92 : vector<8x128xf32>
    %c126_i32_57 = arith.constant 126 : i32
    %94 = tpu.dynamic_rotate %75 by %c126_i32_57 dim 1 : vector<8x128xf32>, i32 -> vector<8x128xf32>
    %c4_58 = arith.constant 4 : index
    %c0_59 = arith.constant 0 : index
    %c0_60 = arith.constant 0 : index
    %95 = vector.load %arg2[%c4_58, %c0_59, %c0_60] : memref<5x8x8xf32, #tpu.memory_space<vmem>>, vector<1x8x8xf32>
    %96 = vector.shape_cast %95 : vector<1x8x8xf32> to vector<8x8xf32>
    %cst_61 = arith.constant dense<0.000000e+00> : vector<8x128xf32>
    %97 = tpu.matmul %96, %94, %cst_61 {dimension_numbers = #tpu.dot_dimension_numbers<[1], [0], [0], [1], [0, 0, 1, 1], [], []>} : vector<8x8xf32>, vector<8x128xf32>, vector<8x128xf32> -> vector<8x128xf32>
    %98 = arith.addf %93, %97 : vector<8x128xf32>
    %99 = vector.broadcast %19 : vector<1x128xf32> to vector<8x128xf32>
    %100 = arith.mulf %98, %99 : vector<8x128xf32>
    %cst_62 = arith.constant dense<0.000000e+00> : vector<8x1xf32>
    %101 = tpu.matmul %100, %20, %cst_62 {dimension_numbers = #tpu.dot_dimension_numbers<[1], [0], [0], [1], [0, 0, 1, 1], [], []>} : vector<8x128xf32>, vector<128x1xf32>, vector<8x1xf32> -> vector<8x1xf32>
    %102 = arith.mulf %100, %98 : vector<8x128xf32>
    %cst_63 = arith.constant dense<0.000000e+00> : vector<8x1xf32>
    %103 = tpu.matmul %102, %20, %cst_63 {dimension_numbers = #tpu.dot_dimension_numbers<[1], [0], [0], [1], [0, 0, 1, 1], [], []>} : vector<8x128xf32>, vector<128x1xf32>, vector<8x1xf32> -> vector<8x1xf32>
    %cst_64 = arith.constant 3.125000e-02 : f32
    %104 = vector.broadcast %cst_64 : f32 to vector<8x1xf32>
    %105 = arith.mulf %101, %104 : vector<8x1xf32>
    %cst_65 = arith.constant 3.125000e-02 : f32
    %106 = vector.broadcast %cst_65 : f32 to vector<8x1xf32>
    %107 = arith.mulf %103, %106 : vector<8x1xf32>
    %108 = arith.mulf %105, %105 : vector<8x1xf32>
    %109 = arith.subf %107, %108 : vector<8x1xf32>
    %cst_66 = arith.constant 9.99999974E-6 : f32
    %110 = vector.broadcast %cst_66 : f32 to vector<8x1xf32>
    %111 = arith.addf %109, %110 : vector<8x1xf32>
    %112 = math.rsqrt %111 : vector<8x1xf32>
    %113 = arith.mulf %23, %112 : vector<8x1xf32>
    %114 = arith.mulf %105, %113 : vector<8x1xf32>
    %115 = arith.subf %24, %114 : vector<8x1xf32>
    %116 = vector.broadcast %113 : vector<8x1xf32> to vector<8x128xf32>
    %117 = arith.mulf %98, %116 : vector<8x128xf32>
    %118 = vector.broadcast %115 : vector<8x1xf32> to vector<8x128xf32>
    %119 = arith.addf %117, %118 : vector<8x128xf32>
    %c0_67 = arith.constant 0 : index
    %c4_68 = arith.constant 4 : index
    %120 = vector.load %arg3[%c0_67, %c4_68] : memref<8x6xf32, #tpu.memory_space<vmem>>, vector<8x1xf32>
    %c0_69 = arith.constant 0 : index
    %c5 = arith.constant 5 : index
    %121 = vector.load %arg3[%c0_69, %c5] : memref<8x6xf32, #tpu.memory_space<vmem>>, vector<8x1xf32>
    %c0_70 = arith.constant 0 : index
    %c0_71 = arith.constant 0 : index
    %122 = vector.load %arg4[%c0_70, %c0_71] : memref<8x8xf32, #tpu.memory_space<vmem>>, vector<8x8xf32>
    %cst_72 = arith.constant dense<0.000000e+00> : vector<8x128xf32>
    %123 = tpu.matmul %122, %0, %cst_72 {dimension_numbers = #tpu.dot_dimension_numbers<[1], [0], [0], [1], [0, 0, 1, 1], [], []>} : vector<8x8xf32>, vector<8x128xf32>, vector<8x128xf32> -> vector<8x128xf32>
    %cst_73 = arith.constant dense<0.000000e+00> : vector<8x1xf32>
    %124 = tpu.matmul %123, %20, %cst_73 {dimension_numbers = #tpu.dot_dimension_numbers<[1], [0], [0], [1], [0, 0, 1, 1], [], []>} : vector<8x128xf32>, vector<128x1xf32>, vector<8x1xf32> -> vector<8x1xf32>
    %125 = arith.mulf %123, %123 : vector<8x128xf32>
    %cst_74 = arith.constant dense<0.000000e+00> : vector<8x1xf32>
    %126 = tpu.matmul %125, %20, %cst_74 {dimension_numbers = #tpu.dot_dimension_numbers<[1], [0], [0], [1], [0, 0, 1, 1], [], []>} : vector<8x128xf32>, vector<128x1xf32>, vector<8x1xf32> -> vector<8x1xf32>
    %cst_75 = arith.constant 3.125000e-02 : f32
    %127 = vector.broadcast %cst_75 : f32 to vector<8x1xf32>
    %128 = arith.mulf %124, %127 : vector<8x1xf32>
    %cst_76 = arith.constant 3.125000e-02 : f32
    %129 = vector.broadcast %cst_76 : f32 to vector<8x1xf32>
    %130 = arith.mulf %126, %129 : vector<8x1xf32>
    %131 = arith.mulf %128, %128 : vector<8x1xf32>
    %132 = arith.subf %130, %131 : vector<8x1xf32>
    %cst_77 = arith.constant 9.99999974E-6 : f32
    %133 = vector.broadcast %cst_77 : f32 to vector<8x1xf32>
    %134 = arith.addf %132, %133 : vector<8x1xf32>
    %135 = math.rsqrt %134 : vector<8x1xf32>
    %136 = arith.mulf %120, %135 : vector<8x1xf32>
    %137 = arith.mulf %128, %136 : vector<8x1xf32>
    %138 = arith.subf %121, %137 : vector<8x1xf32>
    %139 = vector.broadcast %136 : vector<8x1xf32> to vector<8x128xf32>
    %140 = arith.mulf %123, %139 : vector<8x128xf32>
    %141 = vector.broadcast %138 : vector<8x1xf32> to vector<8x128xf32>
    %142 = arith.addf %140, %141 : vector<8x128xf32>
    %143 = arith.addf %119, %142 : vector<8x128xf32>
    %cst_78 = arith.constant 0.000000e+00 : f32
    %144 = vector.broadcast %cst_78 : f32 to vector<8x128xf32>
    %145 = arith.cmpf ogt, %143, %144 : vector<8x128xf32>
    %cst_79 = arith.constant 2.000000e-01 : f32
    %146 = vector.broadcast %cst_79 : f32 to vector<8x128xf32>
    %147 = arith.mulf %146, %143 : vector<8x128xf32>
    %148 = arith.select %145, %143, %147 : vector<8x128xi1>, vector<8x128xf32>
    %c0_80 = arith.constant 0 : index
    %c0_81 = arith.constant 0 : index
    %149 = vector.load %arg5[%c0_80, %c0_81] : memref<8x128xf32, #tpu.memory_space<vmem>>, vector<8x128xf32>
    tpu.vector_store %arg5[%c0_80, %c0_81], %148 {strides = array<i32>} : memref<8x128xf32, #tpu.memory_space<vmem>>, vector<8x128xf32>,
    return
  }
}

</mosaic_0001>

<bundles_post_ra>
// kernel: tpu_custom_call.1
= control target key start
LH: loop header
LB: loop body
LE: loop exit
PB: predicated region body
PF: predicated region fallthrough
CT: control target
= control target key end

     0   :  { %10 = vsyncpa [#allocation3], 0  ;;  %s2414_s0 = inlined_call_operand.hbm [shape: f32[8,128], index: 0, kind: input, shape index: {}]   ;;  %s2415_s1 = inlined_call_operand.hbm [shape: f32[5,8,8], index: 1, kind: input, shape index: {}]   ;;  %s2416_s2 = inlined_call_operand.hbm [shape: f32[5,8,8], index: 2, kind: input, shape index: {}]   ;;  %s2417_s3 = inlined_call_operand.hbm [shape: f32[8,6], index: 3, kind: input, shape index: {}]   ;;  %s2418_s4 = inlined_call_operand.hbm [shape: f32[8,8], index: 4, kind: input, shape index: {}]   ;;  %s2419_s5 = inlined_call_operand.hbm [shape: f32[8,128], index: 5, kind: output, shape index: {}]  }
   0x1   :  { %11 = vsyncpa [#allocation6], 0 }
   0x2   :  { %12 = vsyncpa [#allocation9], 0 }
   0x3   :  { %13 = vsyncpa [#allocation4], 0  ;;  %s2049_s18 = smov [#allocation5]  }
   0x4   :  { %s29_s19 = sshll.u32 %s2049_s18, 4  ;;  %s30_s19 = int_to_ptr.vmem [resolvable:$true] %s29_s19 }
   0x5   :  { %s1929_s20 = scalar_lea.vmem %s30_s19, 640  ;;  %p1934_p1 = scmp.lt.s32.totalorder %s30_s19, %s30_s19 }
   0x6   :  { %p1930_p0 = scmp.ne.s32.totalorder %s30_s19, %s1929_s20  ;;  %p1935_p2 = scmp.lt.s32.totalorder %s1929_s20, %s1929_s20 }
   0x8   :  { %p1936_p3 = por %p1935_p2, %p1934_p1 }
   0xa   :  { %p1937_p4 = pnand %p1936_p3, %p1930_p0 }
   0xc   :  { %1940 = shalt.err (!%p1937_p4)
}
   0xd   :  { %s2050_s21 = smov 128   ;;  %s2051_s22 = smov 8  }
   0xe   :  { %35 = dma.hbm_to_vmem [thread:$0]  %s2415_s1, 640, %s30_s19, [#allocation6], %s2050_s21, %s2050_s21, %s2051_s22  }
   0xf   :  { %s2052_s25 = smov [#allocation8]   ;;  %s2053_s27 = smov [#allocation2]  }
  0x10   :  { %s54_s26 = sshll.u32 %s2052_s25, 4  ;;  %s20_s28 = sshll.u32 %s2053_s27, 4  ;;  %s55_s26 = int_to_ptr.vmem [resolvable:$true] %s54_s26  ;;  %s21_s28 = int_to_ptr.vmem [resolvable:$true] %s20_s28 }
  0x11   :  { %s1949_s29 = scalar_lea.vmem %s55_s26, 128  ;;  %p1954_p6 = scmp.lt.s32.totalorder %s55_s26, %s55_s26 }
  0x12   :  { %p1950_p5 = scmp.ne.s32.totalorder %s55_s26, %s1949_s29  ;;  %p1955_p7 = scmp.lt.s32.totalorder %s1949_s29, %s1949_s29 }
  0x14   :  { %p1956_p8 = por %p1955_p7, %p1954_p6 }
  0x16   :  { %p1957_p9 = pnand %p1956_p8, %p1950_p5 }
  0x18   :  { %1960 = shalt.err (!%p1957_p9)
}
  0x19   :  { %57 = dma.hbm_to_vmem [thread:$0]  %s2417_s3, 128, %s55_s26, [#allocation9]  }
  0x1a   :  { %s1969_s7 = scalar_lea.vmem %s21_s28, 128  ;;  %p1974_p11 = scmp.lt.s32.totalorder %s21_s28, %s21_s28 }
  0x1b   :  { %p1970_p10 = scmp.ne.s32.totalorder %s21_s28, %s1969_s7  ;;  %p1975_p12 = scmp.lt.s32.totalorder %s1969_s7, %s1969_s7 }
  0x1d   :  { %p1976_p13 = por %p1975_p12, %p1974_p11 }
  0x1f   :  { %p1977_p0 = pnand %p1976_p13, %p1970_p10 }
  0x21   :  { %1980 = shalt.err (!%p1977_p0)
}
  0x22   :  { %23 = dma.hbm_to_vmem [thread:$0]  %s2414_s0, 128, %s21_s28, [#allocation3]  }
  0x23   :  { %s2054_s9 = smov [#allocation7]   ;;  %s2055_s11 = smov [#allocation10]  }
  0x24   :  { %s41_s10 = sshll.u32 %s2054_s9, 4  ;;  %s64_s12 = sshll.u32 %s2055_s11, 4  ;;  %s42_s10 = int_to_ptr.vmem [resolvable:$true] %s41_s10  ;;  %s65_s12 = int_to_ptr.vmem [resolvable:$true] %s64_s12 }
  0x25   :  { %s1989_s13 = scalar_lea.vmem %s42_s10, 640  ;;  %p1994_p2 = scmp.lt.s32.totalorder %s42_s10, %s42_s10 }
  0x26   :  { %p1990_p1 = scmp.ne.s32.totalorder %s42_s10, %s1989_s13  ;;  %p1995_p3 = scmp.lt.s32.totalorder %s1989_s13, %s1989_s13 }
  0x28   :  { %p1996_p4 = por %p1995_p3, %p1994_p2 }
  0x2a   :  { %p1997_p5 = pnand %p1996_p4, %p1990_p1 }
  0x2c   :  { %2000 = shalt.err (!%p1997_p5)
}
  0x2d   :  { %47 = dma.hbm_to_vmem [thread:$0]  %s2416_s2, 640, %s42_s10, [#allocation6], %s2050_s21, %s2050_s21, %s2051_s22  }
  0x2e   :  { %s2009_s0 = scalar_lea.vmem %s65_s12, 128  ;;  %p2014_p7 = scmp.lt.s32.totalorder %s65_s12, %s65_s12 }
  0x2f   :  { %p2010_p6 = scmp.ne.s32.totalorder %s65_s12, %s2009_s0  ;;  %p2015_p8 = scmp.lt.s32.totalorder %s2009_s0, %s2009_s0 }
  0x31   :  { %p2016_p9 = por %p2015_p8, %p2014_p7 }
  0x33   :  { %p2017_p10 = pnand %p2016_p9, %p2010_p6 }
  0x35   :  { %2020 = shalt.err (!%p2017_p10)
}
  0x36   :  { %67 = dma.hbm_to_vmem [thread:$0]  %s2418_s4, 128, %s65_s12, [#allocation9]  }
  0x37   :  { %2041 = dma.done.wait [#allocation3], 128  }
  0x38   :  { %2042 = vsyncadd [#allocation3], 4294967168 }
  0x39   :  { %2043 = dma.done.wait [#allocation6], 1280  }
  0x3a   :  { %2044 = vsyncadd [#allocation6], 4294966016 }
  0x3b   :  { %2045 = dma.done.wait [#allocation9], 256  }
  0x3c   :  { %2046 = vsyncadd [#allocation9], 4294967040  ;;  %v2056_v0 = vmov 0.0   ;;  %vm2057_vm0 = vmmov 0   ;;  %v2131_v1 = vld [vmem:[#allocation2] sm:$0xff]  ;;  %vm104_vm1 = vcmask 64512   ;;  %v84_v14 = vlaneseq }
  0x3d   :  { %1619 = vmatprep.subr.mxu0 %v2056_v0  ;;  %1624 = vmatprep.subr.mxu1 %v2056_v0  ;;  %v100_v2 = vld [vmem:[#allocation5 + $0x10] sm:$0xff]  ;;  %s2058_s2 = smov 2   ;;  %s2059_s4 = smov 127   ;;  %v103_v3 = vld [vmem:[#allocation5] sm:$0xff]  ;;  %v332_v6 = vld [vmem:[#allocation5 + $0x18] sm:$0xff]  ;;  %v2062_v10 = vmov 1.0  }
  0x3e   :  { %1621 = vmatprep.mubr.msk.f32.mxu0 %vm2057_vm0, %v2056_v0  ;;  %1626 = vmatprep.mubr.msk.f32.mxu1 %vm2057_vm0, %v2056_v0  ;;  %s2060_s17 = smov 1   ;;  %s2061_s18 = smov 126   ;;  %v254_v7 = vld [vmem:[#allocation5 + $0x8] sm:$0xff]  ;;  %v410_v11 = vld [vmem:[#allocation5 + $0x20] sm:$0xff]  ;;  %v85_v15 = vand.u32 127, %v84_v14  ;;  %v2063_v36 = vmov 0  }
  0x3f   :  { %101 = vrot.lane.b32.xlu0 %v2131_v1, %s2058_s2  ;;  %329 = vrot.lane.b32.xlu1 %v2131_v1, %s2059_s4  ;;  %v2064_v46 = vmov 1   ;;  %v2234_v47 = vld [vmem:[#allocation8] sm:$0xff]  ;;  %v657_v60 = vld [vmem:[#allocation7 + $0x10] sm:$0xff]  ;;  %v660_v61 = vld [vmem:[#allocation7] sm:$0xff]  ;;  %s2066_s19 = smov 4   ;;  %s2067_s20 = smov 3  }
  0x40   :  { %1625 = vmatpush3.msra.mxu1 %v2131_v1  ;;  %v86_v16 = vcvt.s32.f32 %v85_v15  ;;  %vm92_vm2 = vcmp.lt.s32.totalorder %v85_v15, 40  ;;  %1909 = vset.pattern.permute.xlu1 %v2063_v36  ;;  %s2069_s21 = smov 124   ;;  %s2071_s22 = smov 5  }
  0x41   :  { %1627 = vmatmul.mubr.msk.f32.vlgmr.msra.gmra.mxu1 %vm104_vm1, %v100_v2  ;;  %1634 = vmatprep.subr.mxu1 %v2056_v0  ;;  %v888_v2 = vld [vmem:[#allocation7 + $0x18] sm:$0xff]  ;;  %s2073_s23 = smov [#allocation11]  }
  0x42   :  { %1636 = vmatprep.mubr.msk.f32.mxu1 %vm2057_vm0, %v2056_v0  ;;  %v88_v17 = vmul.f32 0.05, %v86_v16  ;;  %1910 = vset.pattern.permute.xlu0 %v2064_v46  ;;  %s1473_s24 = sshll.u32 %s2073_s23, 4  ;;  %s1474_s24 = int_to_ptr.vmem [resolvable:$true] %s1473_s24 }
  0x43   :  { %251 = vrot.lane.b32.xlu0 %v2131_v1, %s2060_s17  ;;  %407 = vrot.lane.b32.xlu1 %v2131_v1, %s2061_s18  ;;  %s2021_s25 = scalar_lea.vmem %s1474_s24, 128  ;;  %p2026_p12 = scmp.lt.s32.totalorder %s1474_s24, %s1474_s24 }
  0x44   :  { %v89_v18 = vfloor.f32 %v88_v17  ;;  %p2022_p11 = scmp.ne.s32.totalorder %s1474_s24, %s2021_s25  ;;  %p2027_p13 = scmp.lt.s32.totalorder %s2021_s25, %s2021_s25 }
  0x46   :  { %v90_v19 = vmul.f32 20.0, %v89_v18  ;;  %p2028_p0 = por %p2027_p13, %p2026_p12 }
  0x48   :  { %v91_v20 = vsub.f32 %v86_v16, %v90_v19  ;;  %p2029_p1 = pnand %p2028_p0, %p2022_p11 }
  0x4a   :  { %vm93_vm3 = vcmp.ge.f32.partialorder %v91_v20, 2.0  ;;  %vm95_vm5 = vcmp.lt.f32.partialorder %v91_v20, 18.0 }
  0x4b   :  { %vm94_vm4 = vmand %vm92_vm2, %vm93_vm3 }
  0x4c   :  { %vm96_vm6 = vmand %vm94_vm4, %vm95_vm5 }
  0x4d   :  { %v2227_v30 = vsel %vm96_vm6, 1.0, %v2056_v0 }
  0xb1   :  { %v102_v4 = vpop.permute.xlu0 %101  ;;  %v330_v5 = vpop.permute.xlu1 %329 }
  0xb2   :  { %1620 = vmatpush3.msra.mxu0 %v102_v4  ;;  %1635 = vmatpush3.msra.mxu1 %v330_v5  ;;  %v966_v5 = vld [vmem:[#allocation7 + $0x20] sm:$0xff] }
  0xb3   :  { %1622 = vmatmul.mubr.msk.f32.vlgmr.msra.gmra.mxu0 %vm104_vm1, %v103_v3  ;;  %1629 = vmatprep.subr.mxu0 %v2056_v0  ;;  %v810_v3 = vld [vmem:[#allocation7 + $0x8] sm:$0xff] }
  0xb4   :  { %1631 = vmatprep.mubr.msk.f32.mxu0 %vm2057_vm0, %v2056_v0  ;;  %1637 = vmatmul.mubr.msk.f32.vlgmr.msra.gmra.mxu1 %vm104_vm1, %v332_v6 }
  0xb5   :  { %v252_v8 = vpop.permute.xlu0 %251  ;;  %v408_v9 = vpop.permute.xlu1 %407  ;;  %1644 = vmatprep.subr.mxu1 %v2056_v0  ;;  %1676 = vmatprep.mubr.msk.f32.mxu1 %vm2057_vm0, %v2056_v0 }
  0xb6   :  { %1630 = vmatpush3.msra.mxu0 %v252_v8  ;;  %1645 = vmatpush3.msra.mxu1 %v2062_v10 }
  0xb7   :  { %1632 = vmatmul.mubr.msk.f32.vlgmr.msra.gmra.mxu0 %vm104_vm1, %v254_v7  ;;  %1639 = vmatprep.subr.mxu0 %v2056_v0 }
  0xb8   :  { %1640 = vmatpush3.msra.mxu0 %v408_v9  ;;  %1641 = vmatprep.mubr.msk.f32.mxu0 %vm2057_vm0, %v2056_v0 }
  0xb9   :  { %1646 = vmatprep.subr.mxu1 %v2056_v0  ;;  %1679 = vmatprep.subr.mxu0 %v2056_v0 }
  0xba   :  { %1647 = vmatpush3.msra.mxu1 %v2062_v10 }
  0xbb   :  { %1642 = vmatmul.mubr.msk.f32.vlgmr.msra.gmra.mxu0 %vm104_vm1, %v410_v11  ;;  %1648 = vmatprep.subr.mxu1 %v2056_v0 }
  0xbc   :  { %1680 = vmatpush3.msra.mxu0 %v2062_v10  ;;  %1649 = vmatpush3.msra.mxu1 %v2062_v10 }
  0xbd   :  { %1681 = vmatprep.subr.mxu0 %v2056_v0  ;;  %1650 = vmatprep.subr.mxu1 %v2056_v0 }
  0xbe   :  { %1682 = vmatpush3.msra.mxu0 %v2062_v10  ;;  %1651 = vmatpush3.msra.mxu1 %v2062_v10 }
  0xbf   :  { %1683 = vmatprep.subr.mxu0 %v2056_v0  ;;  %1652 = vmatprep.subr.mxu1 %v2056_v0 }
  0xc0   :  { %1684 = vmatpush3.msra.mxu0 %v2062_v10  ;;  %1653 = vmatpush3.msra.mxu1 %v2062_v10 }
  0xc1   :  { %1685 = vmatprep.subr.mxu0 %v2056_v0  ;;  %1654 = vmatprep.subr.mxu1 %v2056_v0 }
  0xc2   :  { %1686 = vmatpush3.msra.mxu0 %v2062_v10  ;;  %1655 = vmatpush3.msra.mxu1 %v2062_v10 }
  0xc3   :  { %1687 = vmatprep.subr.mxu0 %v2056_v0  ;;  %1656 = vmatprep.subr.mxu1 %v2056_v0 }
  0xc4   :  { %1688 = vmatpush3.msra.mxu0 %v2062_v10  ;;  %1657 = vmatpush3.msra.mxu1 %v2062_v10 }
  0xc5   :  { %1689 = vmatprep.subr.mxu0 %v2056_v0  ;;  %1658 = vmatprep.subr.mxu1 %v2056_v0 }
  0xc6   :  { %1690 = vmatpush3.msra.mxu0 %v2062_v10  ;;  %1659 = vmatpush3.msra.mxu1 %v2062_v10 }
  0xc7   :  { %1691 = vmatprep.subr.mxu0 %v2056_v0  ;;  %1660 = vmatprep.subr.mxu1 %v2056_v0 }
  0xc8   :  { %1692 = vmatpush3.msra.mxu0 %v2062_v10  ;;  %1661 = vmatpush3.msra.mxu1 %v2062_v10 }
  0xc9   :  { %1693 = vmatprep.subr.mxu0 %v2056_v0  ;;  %1662 = vmatprep.subr.mxu1 %v2056_v0 }
  0xca   :  { %1694 = vmatpush3.msra.mxu0 %v2062_v10  ;;  %1663 = vmatpush3.msra.mxu1 %v2062_v10 }
  0xcb   :  { %1695 = vmatprep.subr.mxu0 %v2056_v0  ;;  %1664 = vmatprep.subr.mxu1 %v2056_v0 }
  0xcc   :  { %1696 = vmatpush3.msra.mxu0 %v2062_v10  ;;  %1665 = vmatpush3.msra.mxu1 %v2062_v10 }
  0xcd   :  { %1697 = vmatprep.subr.mxu0 %v2056_v0  ;;  %1666 = vmatprep.subr.mxu1 %v2056_v0 }
  0xce   :  { %1698 = vmatpush3.msra.mxu0 %v2062_v10  ;;  %1667 = vmatpush3.msra.mxu1 %v2062_v10 }
  0xcf   :  { %1699 = vmatprep.subr.mxu0 %v2056_v0  ;;  %1668 = vmatprep.subr.mxu1 %v2056_v0 }
  0xd0   :  { %1700 = vmatpush3.msra.mxu0 %v2062_v10  ;;  %1669 = vmatpush3.msra.mxu1 %v2062_v10 }
  0xd1   :  { %1701 = vmatprep.subr.mxu0 %v2056_v0  ;;  %1670 = vmatprep.subr.mxu1 %v2056_v0 }
  0xd2   :  { %1702 = vmatpush3.msra.mxu0 %v2062_v10  ;;  %1671 = vmatpush3.msra.mxu1 %v2062_v10 }
  0xd3   :  { %1703 = vmatprep.subr.mxu0 %v2056_v0  ;;  %1672 = vmatprep.subr.mxu1 %v2056_v0 }
  0xd4   :  { %1704 = vmatpush3.msra.mxu0 %v2062_v10  ;;  %1673 = vmatpush3.msra.mxu1 %v2062_v10 }
  0xd5   :  { %1705 = vmatprep.subr.mxu0 %v2056_v0  ;;  %1674 = vmatprep.subr.mxu1 %v2056_v0 }
  0xd6   :  { %1706 = vmatpush3.msra.mxu0 %v2062_v10  ;;  %1675 = vmatpush3.msra.mxu1 %v2062_v10 }
  0xd7   :  { %1707 = vmatprep.subr.mxu0 %v2056_v0  ;;  %1711 = vmatprep.mubr.msk.f32.mxu0 %vm2057_vm0, %v2056_v0 }
  0xd8   :  { %1708 = vmatpush3.msra.mxu0 %v2062_v10  ;;  %1714 = vmatprep.subr.mxu1 %v2056_v0 }
  0xd9   :  { %1709 = vmatprep.subr.mxu0 %v2056_v0 }
  0xda   :  { %1710 = vmatpush3.msra.mxu0 %v2062_v10 }
  0xdb   :  { %1719 = vmatprep.subr.mxu0 %v2056_v0 }
 0x101   :  { %v247_v12 = vpop.f32.mrf.mxu1 }
 0x103   :  { %v1628_v13 = vpop.f32.mrf.mxu1 }
 0x173   :  { %v174_v21 = vpop.f32.mrf.mxu0 }
 0x174   :  { %v402_v22 = vpop.f32.mrf.mxu1  ;;  %v248_v24 = vadd.f32 %v247_v12, %v174_v21 }
 0x175   :  { %v1623_v23 = vpop.f32.mrf.mxu0 }
 0x176   :  { %v1638_v25 = vpop.f32.mrf.mxu1 }
 0x177   :  { %v324_v26 = vpop.f32.mrf.mxu0 }
 0x178   :  { %v328_v27 = vadd.f32 %v324_v26, %v248_v24  ;;  %v1215_v24 = vld [vmem:[#allocation10] sm:$0xff] }
 0x179   :  { %v1633_v28 = vpop.f32.mrf.mxu0 }
 0x17a   :  { %v406_v29 = vadd.f32 %v402_v22, %v328_v27 }
 0x17b   :  { %v480_v31 = vpop.f32.mrf.mxu0 }
 0x17c   :  { %v484_v32 = vadd.f32 %v480_v31, %v406_v29 }
 0x17d   :  { %v1643_v33 = vpop.f32.mrf.mxu0 }
 0x17e   :  { %v485_v34 = vmul.f32 %v484_v32, %v2227_v30 }
 0x180   :  { %v556_v35 = vmul.f32 %v485_v34, %v484_v32  ;;  %1677 = vmatmul.mubr.f32.vlgmr.msra.gmra.mxu1 %v485_v34 }
 0x181   :  { %1716 = vmatprep.mubr.msk.f32.mxu1 %vm2057_vm0, %v2056_v0 }
 0x182   :  { %1712 = vmatmul.mubr.f32.vlgmr.msra.gmra.mxu0 %v556_v35 }
 0x183   :  { %1721 = vmatprep.mubr.msk.f32.mxu0 %vm2057_vm0, %v2056_v0 }
 0x240   :  { %v552_v37 = vpop.f32.mrf.mxu1 }
 0x241   :  { %v627_v38 = vmul.f32 0.03125, %v552_v37 }
 0x242   :  { %v1678_v39 = vpop.f32.mrf.mxu1  ;;  %v623_v40 = vpop.f32.mrf.mxu0 }
 0x243   :  { %v629_v41 = vmul.f32 %v627_v38, %v627_v38  ;;  %v628_v42 = vmul.f32 0.03125, %v623_v40 }
 0x244   :  { %v1713_v43 = vpop.f32.mrf.mxu0 }
 0x245   :  { %v630_v44 = vsub.f32 %v628_v42, %v629_v41 }
 0x247   :  { %v631_v45 = vadd.f32 1e-05, %v630_v44 }
 0x249   :  { %1915 = vrsqrt.f32 %v631_v45 }
 0x256   :  { %v1916_v48 = vpop.eup %1915 }
 0x257   :  { %v633_v49 = vmul.f32 %v1916_v48, %v2234_v47 }
 0x259   :  { %642 = vperm.xlu1 %1909, %v633_v49   ;;  %v634_v50 = vmul.f32 %v633_v49, %v627_v38 }
 0x25b   :  { %636 = vrot.lane.b32.xlu0 %v634_v50, %s2060_s17 }
 0x2cd   :  { %v637_v51 = vpop.permute.xlu0 %636 }
 0x2ce   :  { %v639_v52 = vsub.f32 %v2234_v47, %v637_v51  ;;  %v2068_v51 = vmov 4  }
 0x2cf   :  { %1912 = vset.pattern.permute.xlu1 %v2068_v51 }
 0x2d0   :  { %648 = vperm.xlu0 %1910, %v639_v52  }
 0x2d4   :  { %v643_v53 = vpop.permute.xlu1 %642 }
 0x2d5   :  { %v645_v54 = vmul.f32 %v643_v53, %v484_v32 }
 0x34b   :  { %v649_v55 = vpop.permute.xlu0 %648 }
 0x34c   :  { %v651_v56 = vadd.f32 %v649_v55, %v645_v54  ;;  %v2070_v54 = vmov 5  }
 0x34e   :  { %vm652_vm7 = vcmp.gt.f32.partialorder %v651_v56, 0.0  ;;  %v653_v57 = vmul.f32 0.2, %v651_v56 }
 0x350   :  { %v654_v58 = vsel %vm652_vm7, %v651_v56, %v653_v57 }
 0x351   :  { %v655_v59 = vmul.f32 %v654_v58, %v2227_v30 }
 0x353   :  { %885 = vrot.lane.b32.xlu0 %v655_v59, %s2059_s4  ;;  %658 = vrot.lane.b32.xlu1 %v655_v59, %s2058_s2 }
 0x354   :  { %1720 = vmatpush3.msra.mxu0 %v655_v59 }
 0x355   :  { %1729 = vmatprep.subr.mxu0 %v2056_v0  ;;  %1722 = vmatmul.mubr.msk.f32.vlgmr.msra.gmra.mxu0 %vm104_vm1, %v657_v60 }
 0x356   :  { %1731 = vmatprep.mubr.msk.f32.mxu0 %vm2057_vm0, %v2056_v0 }
 0x357   :  { %807 = vrot.lane.b32.xlu1 %v655_v59, %s2060_s17 }
 0x35b   :  { %963 = vrot.lane.b32.xlu1 %v655_v59, %s2061_s18  ;;  %v2072_v59 = vmov 3  }
 0x3c5   :  { %v886_v62 = vpop.permute.xlu0 %885  ;;  %v659_v63 = vpop.permute.xlu1 %658 }
 0x3c6   :  { %1715 = vmatpush3.msra.mxu1 %v659_v63  ;;  %1730 = vmatpush3.msra.mxu0 %v886_v62 }
 0x3c7   :  { %1717 = vmatmul.mubr.msk.f32.vlgmr.msra.gmra.mxu1 %vm104_vm1, %v660_v61  ;;  %1724 = vmatprep.subr.mxu1 %v2056_v0 }
 0x3c8   :  { %1726 = vmatprep.mubr.msk.f32.mxu1 %vm2057_vm0, %v2056_v0  ;;  %1732 = vmatmul.mubr.msk.f32.vlgmr.msra.gmra.mxu0 %vm104_vm1, %v888_v2 }
 0x3c9   :  { %v808_v4 = vpop.permute.xlu1 %807  ;;  %1739 = vmatprep.subr.mxu0 %v2056_v0  ;;  %1771 = vmatprep.mubr.msk.f32.mxu0 %vm2057_vm0, %v2056_v0 }
 0x3ca   :  { %1725 = vmatpush3.msra.mxu1 %v808_v4  ;;  %1740 = vmatpush3.msra.mxu0 %v2062_v10 }
 0x3cb   :  { %1727 = vmatmul.mubr.msk.f32.vlgmr.msra.gmra.mxu1 %vm104_vm1, %v810_v3  ;;  %1734 = vmatprep.subr.mxu1 %v2056_v0 }
 0x3cc   :  { %1736 = vmatprep.mubr.msk.f32.mxu1 %vm2057_vm0, %v2056_v0  ;;  %1741 = vmatprep.subr.mxu0 %v2056_v0 }
 0x3cd   :  { %v964_v6 = vpop.permute.xlu1 %963  ;;  %1742 = vmatpush3.msra.mxu0 %v2062_v10 }
 0x3ce   :  { %1735 = vmatpush3.msra.mxu1 %v964_v6  ;;  %1743 = vmatprep.subr.mxu0 %v2056_v0 }
 0x3cf   :  { %1737 = vmatmul.mubr.msk.f32.vlgmr.msra.gmra.mxu1 %vm104_vm1, %v966_v5  ;;  %1774 = vmatprep.subr.mxu1 %v2056_v0 }
 0x3d0   :  { %1775 = vmatpush3.msra.mxu1 %v2062_v10  ;;  %1744 = vmatpush3.msra.mxu0 %v2062_v10 }
 0x3d1   :  { %1776 = vmatprep.subr.mxu1 %v2056_v0  ;;  %1745 = vmatprep.subr.mxu0 %v2056_v0 }
 0x3d2   :  { %1777 = vmatpush3.msra.mxu1 %v2062_v10  ;;  %1746 = vmatpush3.msra.mxu0 %v2062_v10 }
 0x3d3   :  { %1778 = vmatprep.subr.mxu1 %v2056_v0  ;;  %1747 = vmatprep.subr.mxu0 %v2056_v0 }
 0x3d4   :  { %1779 = vmatpush3.msra.mxu1 %v2062_v10  ;;  %1748 = vmatpush3.msra.mxu0 %v2062_v10 }
 0x3d5   :  { %1780 = vmatprep.subr.mxu1 %v2056_v0  ;;  %1749 = vmatprep.subr.mxu0 %v2056_v0 }
 0x3d6   :  { %1781 = vmatpush3.msra.mxu1 %v2062_v10  ;;  %1750 = vmatpush3.msra.mxu0 %v2062_v10 }
 0x3d7   :  { %1782 = vmatprep.subr.mxu1 %v2056_v0  ;;  %1751 = vmatprep.subr.mxu0 %v2056_v0 }
 0x3d8   :  { %1783 = vmatpush3.msra.mxu1 %v2062_v10  ;;  %1752 = vmatpush3.msra.mxu0 %v2062_v10 }
 0x3d9   :  { %1784 = vmatprep.subr.mxu1 %v2056_v0  ;;  %1753 = vmatprep.subr.mxu0 %v2056_v0 }
 0x3da   :  { %1785 = vmatpush3.msra.mxu1 %v2062_v10  ;;  %1754 = vmatpush3.msra.mxu0 %v2062_v10 }
 0x3db   :  { %1786 = vmatprep.subr.mxu1 %v2056_v0  ;;  %1755 = vmatprep.subr.mxu0 %v2056_v0 }
 0x3dc   :  { %1787 = vmatpush3.msra.mxu1 %v2062_v10  ;;  %1756 = vmatpush3.msra.mxu0 %v2062_v10 }
 0x3dd   :  { %1788 = vmatprep.subr.mxu1 %v2056_v0  ;;  %1757 = vmatprep.subr.mxu0 %v2056_v0 }
 0x3de   :  { %1789 = vmatpush3.msra.mxu1 %v2062_v10  ;;  %1758 = vmatpush3.msra.mxu0 %v2062_v10 }
 0x3df   :  { %1790 = vmatprep.subr.mxu1 %v2056_v0  ;;  %1759 = vmatprep.subr.mxu0 %v2056_v0 }
 0x3e0   :  { %1791 = vmatpush3.msra.mxu1 %v2062_v10  ;;  %1760 = vmatpush3.msra.mxu0 %v2062_v10 }
 0x3e1   :  { %1792 = vmatprep.subr.mxu1 %v2056_v0  ;;  %1761 = vmatprep.subr.mxu0 %v2056_v0 }
 0x3e2   :  { %1793 = vmatpush3.msra.mxu1 %v2062_v10  ;;  %1762 = vmatpush3.msra.mxu0 %v2062_v10 }
 0x3e3   :  { %1794 = vmatprep.subr.mxu1 %v2056_v0  ;;  %1763 = vmatprep.subr.mxu0 %v2056_v0 }
 0x3e4   :  { %1795 = vmatpush3.msra.mxu1 %v2062_v10  ;;  %1764 = vmatpush3.msra.mxu0 %v2062_v10 }
 0x3e5   :  { %1796 = vmatprep.subr.mxu1 %v2056_v0  ;;  %1765 = vmatprep.subr.mxu0 %v2056_v0 }
 0x3e6   :  { %1797 = vmatpush3.msra.mxu1 %v2062_v10  ;;  %1766 = vmatpush3.msra.mxu0 %v2062_v10 }
 0x3e7   :  { %1798 = vmatprep.subr.mxu1 %v2056_v0  ;;  %1767 = vmatprep.subr.mxu0 %v2056_v0 }
 0x3e8   :  { %1799 = vmatpush3.msra.mxu1 %v2062_v10  ;;  %1768 = vmatpush3.msra.mxu0 %v2062_v10 }
 0x3e9   :  { %1800 = vmatprep.subr.mxu1 %v2056_v0  ;;  %1769 = vmatprep.subr.mxu0 %v2056_v0 }
 0x3ea   :  { %1801 = vmatpush3.msra.mxu1 %v2062_v10  ;;  %1770 = vmatpush3.msra.mxu0 %v2062_v10 }
 0x3eb   :  { %1802 = vmatprep.subr.mxu1 %v2056_v0  ;;  %1806 = vmatprep.mubr.msk.f32.mxu1 %vm2057_vm0, %v2056_v0 }
 0x3ec   :  { %1803 = vmatpush3.msra.mxu1 %v2062_v10  ;;  %1809 = vmatprep.subr.mxu0 %v2056_v0 }
 0x3ed   :  { %1804 = vmatprep.subr.mxu1 %v2056_v0 }
 0x3ee   :  { %1805 = vmatpush3.msra.mxu1 %v2062_v10 }
 0x3ef   :  { %1814 = vmatprep.subr.mxu1 %v2056_v0 }
 0x415   :  { %v803_v7 = vpop.f32.mrf.mxu0 }
 0x417   :  { %v1723_v8 = vpop.f32.mrf.mxu0 }
 0x487   :  { %v730_v9 = vpop.f32.mrf.mxu1 }
 0x488   :  { %v958_v11 = vpop.f32.mrf.mxu0  ;;  %v804_v13 = vadd.f32 %v803_v7, %v730_v9 }
 0x489   :  { %v1718_v12 = vpop.f32.mrf.mxu1 }
 0x48a   :  { %v1733_v14 = vpop.f32.mrf.mxu0 }
 0x48b   :  { %v880_v15 = vpop.f32.mrf.mxu1 }
 0x48c   :  { %v884_v16 = vadd.f32 %v880_v15, %v804_v13 }
 0x48d   :  { %v1728_v17 = vpop.f32.mrf.mxu1 }
 0x48e   :  { %v962_v18 = vadd.f32 %v958_v11, %v884_v16 }
 0x48f   :  { %v1036_v19 = vpop.f32.mrf.mxu1 }
 0x490   :  { %v2328_v20 = vadd.f32 %v1036_v19, %v962_v18 }
 0x491   :  { %v1738_v21 = vpop.f32.mrf.mxu1 }
 0x492   :  { %v1041_v22 = vmul.f32 %v2328_v20, %v2227_v30 }
 0x494   :  { %v1112_v23 = vmul.f32 %v1041_v22, %v2328_v20  ;;  %1772 = vmatmul.mubr.f32.vlgmr.msra.gmra.mxu0 %v1041_v22 }
 0x495   :  { %1810 = vmatpush3.msra.mxu0 %v2131_v1  ;;  %1811 = vmatprep.mubr.msk.f32.mxu0 %vm2057_vm0, %v2056_v0 }
 0x496   :  { %1807 = vmatmul.mubr.f32.vlgmr.msra.gmra.mxu1 %v1112_v23  ;;  %1849 = vmatprep.subr.mxu0 %v2056_v0 }
 0x497   :  { %1815 = vmatpush3.msra.mxu1 %v2062_v10  ;;  %1846 = vmatprep.mubr.msk.f32.mxu1 %vm2057_vm0, %v2056_v0 }
 0x498   :  { %1812 = vmatmul.mubr.msk.f32.vlgmr.msra.gmra.mxu0 %vm104_vm1, %v1215_v24  ;;  %1816 = vmatprep.subr.mxu1 %v2056_v0 }
 0x499   :  { %1817 = vmatpush3.msra.mxu1 %v2062_v10  ;;  %1850 = vmatpush3.msra.mxu0 %v2062_v10 }
 0x49a   :  { %1818 = vmatprep.subr.mxu1 %v2056_v0  ;;  %1851 = vmatprep.subr.mxu0 %v2056_v0 }
 0x49b   :  { %1819 = vmatpush3.msra.mxu1 %v2062_v10  ;;  %1852 = vmatpush3.msra.mxu0 %v2062_v10 }
 0x49c   :  { %1820 = vmatprep.subr.mxu1 %v2056_v0  ;;  %1853 = vmatprep.subr.mxu0 %v2056_v0 }
 0x49d   :  { %1821 = vmatpush3.msra.mxu1 %v2062_v10  ;;  %1854 = vmatpush3.msra.mxu0 %v2062_v10 }
 0x49e   :  { %1822 = vmatprep.subr.mxu1 %v2056_v0  ;;  %1855 = vmatprep.subr.mxu0 %v2056_v0 }
 0x49f   :  { %1823 = vmatpush3.msra.mxu1 %v2062_v10  ;;  %1856 = vmatpush3.msra.mxu0 %v2062_v10 }
 0x4a0   :  { %1824 = vmatprep.subr.mxu1 %v2056_v0  ;;  %1857 = vmatprep.subr.mxu0 %v2056_v0 }
 0x4a1   :  { %1825 = vmatpush3.msra.mxu1 %v2062_v10  ;;  %1858 = vmatpush3.msra.mxu0 %v2062_v10 }
 0x4a2   :  { %1826 = vmatprep.subr.mxu1 %v2056_v0  ;;  %1859 = vmatprep.subr.mxu0 %v2056_v0 }
 0x4a3   :  { %1827 = vmatpush3.msra.mxu1 %v2062_v10  ;;  %1860 = vmatpush3.msra.mxu0 %v2062_v10 }
 0x4a4   :  { %1828 = vmatprep.subr.mxu1 %v2056_v0  ;;  %1861 = vmatprep.subr.mxu0 %v2056_v0 }
 0x4a5   :  { %1829 = vmatpush3.msra.mxu1 %v2062_v10  ;;  %1862 = vmatpush3.msra.mxu0 %v2062_v10 }
 0x4a6   :  { %1830 = vmatprep.subr.mxu1 %v2056_v0  ;;  %1863 = vmatprep.subr.mxu0 %v2056_v0 }
 0x4a7   :  { %1831 = vmatpush3.msra.mxu1 %v2062_v10  ;;  %1864 = vmatpush3.msra.mxu0 %v2062_v10 }
 0x4a8   :  { %1832 = vmatprep.subr.mxu1 %v2056_v0  ;;  %1865 = vmatprep.subr.mxu0 %v2056_v0 }
 0x4a9   :  { %1833 = vmatpush3.msra.mxu1 %v2062_v10  ;;  %1866 = vmatpush3.msra.mxu0 %v2062_v10 }
 0x4aa   :  { %1834 = vmatprep.subr.mxu1 %v2056_v0  ;;  %1867 = vmatprep.subr.mxu0 %v2056_v0 }
 0x4ab   :  { %1835 = vmatpush3.msra.mxu1 %v2062_v10  ;;  %1868 = vmatpush3.msra.mxu0 %v2062_v10 }
 0x4ac   :  { %1836 = vmatprep.subr.mxu1 %v2056_v0  ;;  %1869 = vmatprep.subr.mxu0 %v2056_v0 }
 0x4ad   :  { %1837 = vmatpush3.msra.mxu1 %v2062_v10  ;;  %1870 = vmatpush3.msra.mxu0 %v2062_v10 }
 0x4ae   :  { %1838 = vmatprep.subr.mxu1 %v2056_v0  ;;  %1871 = vmatprep.subr.mxu0 %v2056_v0 }
 0x4af   :  { %1839 = vmatpush3.msra.mxu1 %v2062_v10  ;;  %1872 = vmatpush3.msra.mxu0 %v2062_v10 }
 0x4b0   :  { %1840 = vmatprep.subr.mxu1 %v2056_v0  ;;  %1873 = vmatprep.subr.mxu0 %v2056_v0 }
 0x4b1   :  { %1841 = vmatpush3.msra.mxu1 %v2062_v10  ;;  %1874 = vmatpush3.msra.mxu0 %v2062_v10 }
 0x4b2   :  { %1842 = vmatprep.subr.mxu1 %v2056_v0  ;;  %1875 = vmatprep.subr.mxu0 %v2056_v0 }
 0x4b3   :  { %1843 = vmatpush3.msra.mxu1 %v2062_v10  ;;  %1876 = vmatpush3.msra.mxu0 %v2062_v10 }
 0x4b4   :  { %1844 = vmatprep.subr.mxu1 %v2056_v0  ;;  %1877 = vmatprep.subr.mxu0 %v2056_v0 }
 0x4b5   :  { %1845 = vmatpush3.msra.mxu1 %v2062_v10  ;;  %1878 = vmatpush3.msra.mxu0 %v2062_v10 }
 0x4b6   :  { %1879 = vmatprep.subr.mxu0 %v2056_v0  ;;  %1881 = vmatprep.mubr.msk.f32.mxu0 %vm2057_vm0, %v2056_v0  ;;  %v2065_v0 = vmov 2  }
 0x4b7   :  { %1880 = vmatpush3.msra.mxu0 %v2062_v10  ;;  %1911 = vset.pattern.permute.xlu0 %v2065_v0 }
 0x554   :  { %v1108_v1 = vpop.f32.mrf.mxu0 }
 0x555   :  { %v1183_v25 = vmul.f32 0.03125, %v1108_v1 }
 0x556   :  { %v1773_v26 = vpop.f32.mrf.mxu0  ;;  %v1179_v27 = vpop.f32.mrf.mxu1 }
 0x557   :  { %v1185_v28 = vmul.f32 %v1183_v25, %v1183_v25  ;;  %v1184_v29 = vmul.f32 0.03125, %v1179_v27 }
 0x558   :  { %v1808_v30 = vpop.f32.mrf.mxu1  ;;  %v1285_v31 = vpop.f32.mrf.mxu0 }
 0x559   :  { %v1186_v32 = vsub.f32 %v1184_v29, %v1185_v28  ;;  %v1359_v33 = vmul.f32 %v1285_v31, %v1285_v31  ;;  %1847 = vmatmul.mubr.f32.vlgmr.msra.gmra.mxu1 %v1285_v31 }
 0x55a   :  { %v1813_v34 = vpop.f32.mrf.mxu0 }
 0x55b   :  { %v1187_v35 = vadd.f32 1e-05, %v1186_v32  ;;  %1882 = vmatmul.mubr.f32.vlgmr.msra.gmra.mxu0 %v1359_v33 }
 0x55d   :  { %1917 = vrsqrt.f32 %v1187_v35 }
 0x56a   :  { %v1918_v36 = vpop.eup %1917 }
 0x56b   :  { %1190 = vrot.lane.b32.xlu0 %v1918_v36, %s2058_s2 }
 0x5dd   :  { %v1191_v10 = vpop.permute.xlu0 %1190 }
 0x5de   :  { %v1193_v37 = vmul.f32 %v1191_v10, %v2234_v47 }
 0x5e0   :  { %1195 = vrot.lane.b32.xlu0 %v1193_v37, %s2061_s18 }
 0x619   :  { %v1355_v38 = vpop.f32.mrf.mxu1 }
 0x61a   :  { %v1430_v39 = vmul.f32 0.03125, %v1355_v38 }
 0x61b   :  { %v1426_v40 = vpop.f32.mrf.mxu0  ;;  %v1848_v41 = vpop.f32.mrf.mxu1 }
 0x61c   :  { %v1432_v42 = vmul.f32 %v1430_v39, %v1430_v39  ;;  %v1431_v43 = vmul.f32 0.03125, %v1426_v40 }
 0x61d   :  { %v1883_v44 = vpop.f32.mrf.mxu0 }
 0x61e   :  { %v1433_v45 = vsub.f32 %v1431_v43, %v1432_v42 }
 0x620   :  { %v1434_v46 = vadd.f32 1e-05, %v1433_v45 }
 0x622   :  { %1919 = vrsqrt.f32 %v1434_v46 }
 0x62f   :  { %v1920_v48 = vpop.eup %1919 }
 0x630   :  { %1437 = vrot.lane.b32.xlu1 %v1920_v48, %s2066_s19 }
 0x652   :  { %v1196_v49 = vpop.permute.xlu0 %1195 }
 0x653   :  { %v1198_v50 = vmul.f32 %v1196_v49, %v1183_v25 }
 0x655   :  { %1200 = vrot.lane.b32.xlu0 %v1198_v50, %s2067_s20 }
 0x659   :  { %1205 = vperm.xlu0 %1911, %v1193_v37  }
 0x65d   :  { %1914 = vset.pattern.permute.xlu0 %v2070_v54 }
 0x6a2   :  { %v1438_v52 = vpop.permute.xlu1 %1437 }
 0x6a3   :  { %v1440_v53 = vmul.f32 %v1438_v52, %v2234_v47 }
 0x6a5   :  { %1442 = vrot.lane.b32.xlu1 %v1440_v53, %s2069_s21 }
 0x6c7   :  { %v1201_v57 = vpop.permute.xlu0 %1200 }
 0x6c8   :  { %v1203_v58 = vsub.f32 %v2234_v47, %v1201_v57 }
 0x6d4   :  { %v1206_v63 = vpop.permute.xlu0 %1205 }
 0x6d5   :  { %v1208_v3 = vmul.f32 %v1206_v63, %v2328_v20 }
 0x717   :  { %v1443_v55 = vpop.permute.xlu1 %1442 }
 0x718   :  { %v1445_v56 = vmul.f32 %v1443_v55, %v1430_v39 }
 0x71a   :  { %1447 = vrot.lane.b32.xlu1 %v1445_v56, %s2071_s22 }
 0x71e   :  { %1452 = vperm.xlu1 %1912, %v1440_v53  }
 0x722   :  { %1913 = vset.pattern.permute.xlu1 %v2072_v59 }
 0x723   :  { %1211 = vperm.xlu1 %1913, %v1203_v58  }
 0x78c   :  { %v1448_v60 = vpop.permute.xlu1 %1447 }
 0x78d   :  { %v1450_v61 = vsub.f32 %v2234_v47, %v1448_v60 }
 0x78f   :  { %1458 = vperm.xlu0 %1914, %v1450_v61  }
 0x799   :  { %v1453_v62 = vpop.permute.xlu1 %1452 }
 0x79a   :  { %v1455_v4 = vmul.f32 %v1453_v62, %v1285_v31 }
 0x79e   :  { %v1212_v2 = vpop.permute.xlu1 %1211 }
 0x79f   :  { %v1214_v6 = vadd.f32 %v1212_v2, %v1208_v3 }
 0x80a   :  { %v1459_v5 = vpop.permute.xlu0 %1458 }
 0x80b   :  { %v1461_v7 = vadd.f32 %v1459_v5, %v1455_v4 }
 0x80d   :  { %v1462_v8 = vadd.f32 %v1461_v7, %v1214_v6 }
 0x80f   :  { %v1464_v9 = vmul.f32 0.2, %v1462_v8  ;;  %vm1463_vm8 = vcmp.gt.f32.partialorder %v1462_v8, 0.0 }
 0x811   :  { %v1465_v11 = vsel %vm1463_vm8, %v1462_v8, %v1464_v9 }
 0x812   :  { %1466 = vst [vmem:[#allocation11] sm:$0xff] %v1465_v11 }
 0x813   :  { %2032 = shalt.err (!%p2029_p1)
}
 0x814   :  { %1476 = dma.vmem_to_hbm [thread:$0]  %s1474_s24, 128, %s2419_s5, [#allocation4]  }
 0x815   :  { %2047 = dma.done.wait [#allocation4], 128  }
 0x816   :  { %2048 = vsyncadd [#allocation4], 4294967168 }
 0x817   :  { %1480 = vsyncpa [#allocation3], 1 }
 0x818   :  { %1481 = vsyncpa [#allocation6], 1 }
 0x819   :  { %1482 = vsyncpa [#allocation9], 1 }
 0x81a   :  { %1483 = vsyncpa [#allocation4], 1 }

</bundles_post_ra>
